<compile_context>
chip_gen: v6e
topology: v6e:2x2x1
jax: 0.10.0
libtpu: 0.0.40
codegen_flags: <defaults>
</compile_context>

<pallas_src>
import functools

import jax
import jax.numpy as jnp
from jax.experimental import pallas as pl
from jax.experimental.pallas import tpu as pltpu


def _layernorm_kernel(x_ref, a_ref, b_ref, o_ref, *, eps, features):
    """General path: x_ref is a (TR, F) block; reduce over the lane axis."""
    x = x_ref[...].astype(jnp.float32)
    mean = jnp.mean(x, axis=-1, keepdims=True)
    diff = x - mean
    nm1 = features - 1
    scale = (1.0 / nm1) if nm1 > 0 else float("nan")   # torch.std: NaN for N==1
    var = jnp.sum(diff * diff, axis=-1, keepdims=True) * scale
    inv = pl.reciprocal(jnp.sqrt(var) + eps, approx=False)  # exact, keeps 1e-5 tol
    a = a_ref[...].astype(jnp.float32)
    b = b_ref[...].astype(jnp.float32)
    o_ref[...] = ((diff * inv) * a + b).astype(o_ref.dtype)


def _layernorm_folded_kernel(x_ref, seg_ref, a_ref, b_ref, o_ref, *, eps, features):
    """Lane-dense path: x_ref is (TR, 128) super-rows, each packing
    G = 128 // features original rows along lanes.  seg_ref is the (128, 128)
    block-diagonal ones matrix: a matmul against it yields per-segment sums
    already broadcast to every lane of the segment (MXU work, VPU stays free)."""
    x = x_ref[...].astype(jnp.float32)
    seg = seg_ref[...]
    seg_sum = jnp.dot(x, seg, precision=jax.lax.Precision.HIGHEST,
                      preferred_element_type=jnp.float32)
    mean = seg_sum * (1.0 / features)
    diff = x - mean
    seg_sq = jnp.dot(diff * diff, seg, precision=jax.lax.Precision.HIGHEST,
                     preferred_element_type=jnp.float32)
    nm1 = features - 1
    scale = (1.0 / nm1) if nm1 > 0 else float("nan")
    var = seg_sq * scale
    inv = pl.reciprocal(jnp.sqrt(var) + eps, approx=False)
    a = a_ref[...].astype(jnp.float32)
    b = b_ref[...].astype(jnp.float32)
    o_ref[...] = ((diff * inv) * a + b).astype(o_ref.dtype)


def _vmem_capacity_bytes():
    """Per-core VMEM capacity; conservative 64 MiB (v7x) fallback."""
    try:
        info = pltpu.get_tpu_info()
        cap = getattr(info, "vmem_capacity_bytes", None)
        if cap:
            return int(cap)
    except Exception:
        pass
    return 64 * 1024 * 1024


def _pick_row_tile(rows, width, itemsize, budget):
    """Rows per block: big enough to amortize the ~0.35 us per-step overhead,
    capped by block BYTES (not a row count) and by the VMEM budget."""
    sublane = {4: 8, 2: 16, 1: 32}.get(itemsize, 8)
    # 2x in + 2x out double-buffered pipeline blocks (input dtype) plus ~4
    # f32 (TR, W) kernel temporaries (x_f32, diff, seg/sum, y).
    bytes_per_row = 4 * width * itemsize + 4 * width * 4
    tile = budget // max(bytes_per_row, 1)
    # Blocks >= ~1-4 MiB already hit ~85% of HBM roofline; cap at ~8 MiB.
    max_rows_block = (8 * 1024 * 1024) // max(width * itemsize, 1)
    tile = min(tile, max_rows_block)
    if tile >= rows:
        return rows  # single block == full array dims -> always a legal block shape
    return max(sublane, (tile // sublane) * sublane)


def layer_norm(x, a_2, b_2, eps=1e-6, row_tile=None):
    """x: (..., features); a_2, b_2: (features,)"""
    features = x.shape[-1]
    orig_shape = x.shape
    x2d = x.reshape(-1, features)
    rows = x2d.shape[0]
    itemsize = jnp.dtype(x.dtype).itemsize

    cap = _vmem_capacity_bytes()
    budget = cap // 2                 # ~32 MiB on v7x, ~64 MiB on v5e/v6e
    vmem_limit = (cap * 85) // 100    # ~54 MiB on v7x, ~108 MiB on v5e/v6e

    comp = pltpu.CompilerParams(
        dimension_semantics=("parallel",),
        vmem_limit_bytes=int(vmem_limit),
    )

    # ---- Lane-dense fold for small feature dims (e.g. the demo F=32) ----
    fold = 128 // features if (features < 128 and 128 % features == 0) else 1
    if fold > 1 and rows % fold == 0:
        width = features * fold                       # == 128 lanes
        n_rows = rows // fold
        xk = x2d.reshape(n_rows, width)
        a_k = jnp.tile(a_2.reshape(-1), fold).reshape(1, width)
        b_k = jnp.tile(b_2.reshape(-1), fold).reshape(1, width)
        lane = jnp.arange(width, dtype=jnp.int32)
        seg = (lane[:, None] // features == lane[None, :] // features)
        seg = seg.astype(jnp.float32)                 # (128, 128) block-diag ones

        tile = row_tile if row_tile is not None else _pick_row_tile(
            n_rows, width, itemsize, budget)
        grid = (pl.cdiv(n_rows, tile),)               # ragged last block masked

        kernel = functools.partial(
            _layernorm_folded_kernel, eps=eps, features=features)
        out = pl.pallas_call(
            kernel,
            out_shape=jax.ShapeDtypeStruct((n_rows, width), x.dtype),
            grid_spec=pltpu.PrefetchScalarGridSpec(
                num_scalar_prefetch=0,
                grid=grid,
                in_specs=[
                    pl.BlockSpec((tile, width), lambda i: (i, 0)),
                    # Constant index maps -> resident, DMA'd once.
                    pl.BlockSpec((width, width), lambda i: (0, 0)),
                    pl.BlockSpec((1, width), lambda i: (0, 0)),
                    pl.BlockSpec((1, width), lambda i: (0, 0)),
                ],
                out_specs=pl.BlockSpec((tile, width), lambda i: (i, 0)),
            ),
            compiler_params=comp,
        )(xk, seg, a_k, b_k)
        return out.reshape(orig_shape)

    # ---- General path: per-row reduction over the lane axis ----
    # TODO(synk): F < 128 that does not divide 128 still hits masked stores.
    tile = row_tile if row_tile is not None else _pick_row_tile(
        rows, features, itemsize, budget)
    grid = (pl.cdiv(rows, tile),)
    a2d = a_2.reshape(1, features)
    b2d = b_2.reshape(1, features)

    kernel = functools.partial(_layernorm_kernel, eps=eps, features=features)
    out = pl.pallas_call(
        kernel,
        out_shape=jax.ShapeDtypeStruct((rows, features), x.dtype),
        grid_spec=pltpu.PrefetchScalarGridSpec(
            num_scalar_prefetch=0,
            grid=grid,
            in_specs=[
                pl.BlockSpec((tile, features), lambda i: (i, 0)),
                pl.BlockSpec((1, features), lambda i: (0, 0)),
                pl.BlockSpec((1, features), lambda i: (0, 0)),
            ],
            out_specs=pl.BlockSpec((tile, features), lambda i: (i, 0)),
        ),
        compiler_params=comp,
    )(x2d, a2d, b2d)
    return out.reshape(orig_shape)


if __name__ == "__main__":
    key = jax.random.PRNGKey(0)
    batch, seq, hidden = 2, 8, 32

    x = jax.random.normal(key, (batch, seq, hidden), dtype=jnp.float32)

    # Deterministic param init matching nn.Parameter(torch.ones / torch.zeros)
    a_2 = jnp.ones((hidden,), dtype=jnp.float32)
    b_2 = jnp.zeros((hidden,), dtype=jnp.float32)

    out = layer_norm(x, a_2, b_2, eps=1e-6)
    out = jax.block_until_ready(out)

    # Reference check in plain JAX (unbiased std, eps added to std)
    mean = jnp.mean(x, axis=-1, keepdims=True)
    std = jnp.std(x, axis=-1, keepdims=True, ddof=1)
    ref = a_2 * (x - mean) / (std + 1e-6) + b_2
    assert jnp.allclose(out, ref, atol=1e-5, rtol=1e-5), "mismatch vs reference"

    print("KERNEL_OK")
</pallas_src>

<mosaic_0001>
module attributes {stable_mosaic.version = 11 : i64} {
  func.func @_layernorm_folded_kernel(%arg0: i32, %arg1: memref<4x128xf32, #tpu.memory_space<vmem>>, %arg2: memref<128x128xf32, #tpu.memory_space<vmem>>, %arg3: memref<1x128xf32, #tpu.memory_space<vmem>>, %arg4: memref<1x128xf32, #tpu.memory_space<vmem>>, %arg5: memref<4x128xf32, #tpu.memory_space<vmem>>) attributes {dimension_semantics = [#tpu.dimension_semantics<parallel>], iteration_bounds = array<i64: 1>, scalar_prefetch = 0 : i64, scratch_operands = 0 : i64, tpu.core_type = #tpu.core_type<tc>, window_params = [{transform_indices = @transform_0, window_bounds = array<i64: 4, 128>}, {pipeline_mode = #tpu.pipeline_mode<synchronous>, transform_indices = @transform_1, window_bounds = array<i64: 128, 128>}, {pipeline_mode = #tpu.pipeline_mode<synchronous>, transform_indices = @transform_2, window_bounds = array<i64: 1, 128>}, {pipeline_mode = #tpu.pipeline_mode<synchronous>, transform_indices = @transform_3, window_bounds = array<i64: 1, 128>}, {transform_indices = @transform_4, window_bounds = array<i64: 4, 128>}]} {
    %c0 = arith.constant 0 : index
    %c0_0 = arith.constant 0 : index
    %0 = vector.load %arg1[%c0, %c0_0] : memref<4x128xf32, #tpu.memory_space<vmem>>, vector<4x128xf32>
    %c0_1 = arith.constant 0 : index
    %c0_2 = arith.constant 0 : index
    %1 = vector.load %arg2[%c0_1, %c0_2] : memref<128x128xf32, #tpu.memory_space<vmem>>, vector<128x128xf32>
    %cst = arith.constant dense<0.000000e+00> : vector<4x128xf32>
    %2 = tpu.matmul %0, %1, %cst {dimension_numbers = #tpu.dot_dimension_numbers<[1], [0], [0], [1], [0, 0, 1, 1], [], []>, precision = #tpu.contract_precision<fp32>} : vector<4x128xf32>, vector<128x128xf32>, vector<4x128xf32> -> vector<4x128xf32>
    %cst_3 = arith.constant 3.125000e-02 : f32
    %3 = vector.broadcast %cst_3 : f32 to vector<4x128xf32>
    %4 = arith.mulf %2, %3 : vector<4x128xf32>
    %5 = arith.subf %0, %4 : vector<4x128xf32>
    %6 = arith.mulf %5, %5 : vector<4x128xf32>
    %cst_4 = arith.constant dense<0.000000e+00> : vector<4x128xf32>
    %7 = tpu.matmul %6, %1, %cst_4 {dimension_numbers = #tpu.dot_dimension_numbers<[1], [0], [0], [1], [0, 0, 1, 1], [], []>, precision = #tpu.contract_precision<fp32>} : vector<4x128xf32>, vector<128x128xf32>, vector<4x128xf32> -> vector<4x128xf32>
    %cst_5 = arith.constant 0.0322580636 : f32
    %8 = vector.broadcast %cst_5 : f32 to vector<4x128xf32>
    %9 = arith.mulf %7, %8 : vector<4x128xf32>
    %10 = math.sqrt %9 : vector<4x128xf32>
    %cst_6 = arith.constant 9.99999997E-7 : f32
    %11 = vector.broadcast %cst_6 : f32 to vector<4x128xf32>
    %12 = arith.addf %10, %11 : vector<4x128xf32>
    %13 = tpu.reciprocal %12 : vector<4x128xf32> -> vector<4x128xf32>
    %c0_7 = arith.constant 0 : index
    %c0_8 = arith.constant 0 : index
    %14 = vector.load %arg3[%c0_7, %c0_8] : memref<1x128xf32, #tpu.memory_space<vmem>>, vector<1x128xf32>
    %c0_9 = arith.constant 0 : index
    %c0_10 = arith.constant 0 : index
    %15 = vector.load %arg4[%c0_9, %c0_10] : memref<1x128xf32, #tpu.memory_space<vmem>>, vector<1x128xf32>
    %16 = arith.mulf %5, %13 : vector<4x128xf32>
    %17 = vector.broadcast %14 : vector<1x128xf32> to vector<4x128xf32>
    %18 = arith.mulf %16, %17 : vector<4x128xf32>
    %19 = vector.broadcast %15 : vector<1x128xf32> to vector<4x128xf32>
    %20 = arith.addf %18, %19 : vector<4x128xf32>
    %c0_11 = arith.constant 0 : index
    %c0_12 = arith.constant 0 : index
    %21 = vector.load %arg5[%c0_11, %c0_12] : memref<4x128xf32, #tpu.memory_space<vmem>>, vector<4x128xf32>
    tpu.vector_store %arg5[%c0_11, %c0_12], %20 {strides = array<i32>} : memref<4x128xf32, #tpu.memory_space<vmem>>, vector<4x128xf32>,
    return
  }
  func.func @transform_0(%arg0: i32) -> (i32, i32) {
    %c0_i32 = arith.constant 0 : i32
    %c0_i32_0 = arith.constant 0 : i32
    return %arg0, %c0_i32 : i32, i32
  }
  func.func @transform_1(%arg0: i32) -> (i32, i32) {
    %c0_i32 = arith.constant 0 : i32
    %c0_i32_0 = arith.constant 0 : i32
    %c0_i32_1 = arith.constant 0 : i32
    return %c0_i32, %c0_i32_0 : i32, i32
  }
  func.func @transform_2(%arg0: i32) -> (i32, i32) {
    %c0_i32 = arith.constant 0 : i32
    %c0_i32_0 = arith.constant 0 : i32
    %c0_i32_1 = arith.constant 0 : i32
    return %c0_i32, %c0_i32_0 : i32, i32
  }
  func.func @transform_3(%arg0: i32) -> (i32, i32) {
    %c0_i32 = arith.constant 0 : i32
    %c0_i32_0 = arith.constant 0 : i32
    %c0_i32_1 = arith.constant 0 : i32
    return %c0_i32, %c0_i32_0 : i32, i32
  }
  func.func @transform_4(%arg0: i32) -> (i32, i32) {
    %c0_i32 = arith.constant 0 : i32
    %c0_i32_0 = arith.constant 0 : i32
    return %arg0, %c0_i32 : i32, i32
  }
}

</mosaic_0001>

<bundles_post_ra>
// kernel: tpu_custom_call.1
= control target key start
LH: loop header
LB: loop body
LE: loop exit
PB: predicated region body
PF: predicated region fallthrough
CT: control target
= control target key end

     0   :  { %9 = vsyncpa [#allocation3], 0  ;;  %s2776_s0 = inlined_call_operand.hbm [shape: f32[4,128], index: 0, kind: input, shape index: {}]   ;;  %s2777_s1 = inlined_call_operand.hbm [shape: f32[128,128], index: 1, kind: input, shape index: {}]   ;;  %s2778_s2 = inlined_call_operand.vmem [shape: f32[1,128], index: 2, kind: input, shape index: {}]   ;;  %s2779_s3 = inlined_call_operand.vmem [shape: f32[1,128], index: 3, kind: input, shape index: {}]   ;;  %s2780_s4 = inlined_call_operand.hbm [shape: f32[4,128], index: 4, kind: output, shape index: {}]  }
   0x1   :  { %10 = vsyncpa [#allocation6], 0 }
   0x2   :  { %11 = vsyncpa [#allocation4], 0  ;;  %s2093_s15 = smov [#allocation2]   ;;  %s2094_s17 = smov [#allocation5]  }
   0x3   :  { %s18_s16 = sshll.u32 %s2093_s15, 4  ;;  %s27_s18 = sshll.u32 %s2094_s17, 4  ;;  %s19_s16 = int_to_ptr.vmem [resolvable:$true] %s18_s16  ;;  %s28_s18 = int_to_ptr.vmem [resolvable:$true] %s27_s18 }
   0x4   :  { %s2035_s19 = scalar_lea.vmem %s19_s16, 64  ;;  %p2040_p1 = scmp.lt.s32.totalorder %s19_s16, %s19_s16 }
   0x5   :  { %p2036_p0 = scmp.ne.s32.totalorder %s19_s16, %s2035_s19  ;;  %p2041_p2 = scmp.lt.s32.totalorder %s2035_s19, %s2035_s19 }
   0x7   :  { %p2042_p3 = por %p2041_p2, %p2040_p1 }
   0x9   :  { %p2043_p4 = pnand %p2042_p3, %p2036_p0 }
   0xb   :  { %2046 = shalt.err (!%p2043_p4)
}
   0xc   :  { %21 = dma.hbm_to_vmem [thread:$0]  %s2776_s0, 64, %s19_s16, [#allocation3]  }
   0xd   :  { %s2055_s22 = scalar_lea.vmem %s28_s18, 2048  ;;  %p2060_p6 = scmp.lt.s32.totalorder %s28_s18, %s28_s18 }
   0xe   :  { %p2056_p5 = scmp.ne.s32.totalorder %s28_s18, %s2055_s22  ;;  %p2061_p7 = scmp.lt.s32.totalorder %s2055_s22, %s2055_s22 }
  0x10   :  { %p2062_p8 = por %p2061_p7, %p2060_p6 }
  0x12   :  { %p2063_p9 = pnand %p2062_p8, %p2056_p5 }
  0x14   :  { %2066 = shalt.err (!%p2063_p9)
}
  0x15   :  { %s2095_s23 = smov 128   ;;  %s2096_s24 = smov 8  }
  0x16   :  { %33 = dma.hbm_to_vmem [thread:$0]  %s2777_s1, 2048, %s28_s18, [#allocation6], %s2095_s23, %s2095_s23, %s2096_s24  }
  0x17   :  { %2087 = dma.done.wait [#allocation3], 64  }
  0x18   :  { %2088 = vsyncadd [#allocation3], 4294967232 }
  0x19   :  { %2089 = dma.done.wait [#allocation6], 2048  }
  0x1a   :  { %2090 = vsyncadd [#allocation6], 4294965248  ;;  %v2793_v0 = vmov 0.0   ;;  %vm2098_vm0 = vmmov 0   ;;  %v60_v1 = vld [vmem:[#allocation5 + $0x78] sm:$0xff]  ;;  %v59_v2 = vld [vmem:[#allocation5 + $0x70] sm:$0xff] }
  0x1b   :  { %1596 = vmatprep.subr.mxu0 %v2793_v0  ;;  %1631 = vmatprep.subr.mxu1 %v2793_v0  ;;  %v58_v3 = vld [vmem:[#allocation5 + $0x68] sm:$0xff]  ;;  %v2137_v4 = vand.u32 4294901760, %v60_v1  ;;  %v2139_v5 = vand.u32 4294901760, %v59_v2  ;;  %v57_v7 = vld [vmem:[#allocation5 + $0x60] sm:$0xff]  ;;  %v56_v8 = vld [vmem:[#allocation5 + $0x58] sm:$0xff]  ;;  %s2099_s29 = smov [#allocation7]  }
  0x1c   :  { %1628 = vmatprep.mubr.msk.f32.mxu0 %vm2098_vm0, %v2793_v0  ;;  %1663 = vmatprep.mubr.msk.f32.mxu1 %vm2098_vm0, %v2793_v0  ;;  %v2141_v6 = vand.u32 4294901760, %v58_v3  ;;  %v55_v9 = vld [vmem:[#allocation5 + $0x50] sm:$0xff]  ;;  %v2143_v10 = vand.u32 4294901760, %v57_v7  ;;  %v2145_v11 = vand.u32 4294901760, %v56_v8  ;;  %v54_v13 = vld [vmem:[#allocation5 + $0x48] sm:$0xff]  ;;  %v53_v14 = vld [vmem:[#allocation5 + $0x40] sm:$0xff] }
  0x1d   :  { %v2147_v12 = vand.u32 4294901760, %v55_v9  ;;  %1597 = vmatpush3.msra.mxu0 %v2137_v4  ;;  %v2151_v15 = vsub.f32 %v60_v1, %v2137_v4  ;;  %v2154_v16 = vsub.f32 %v59_v2, %v2139_v5  ;;  %v2156_v17 = vand.u32 4294901760, %v54_v13  ;;  %v52_v19 = vld [vmem:[#allocation5 + $0x38] sm:$0xff]  ;;  %v51_v26 = vld [vmem:[#allocation5 + $0x30] sm:$0xff]  ;;  %v50_v36 = vld [vmem:[#allocation5 + $0x28] sm:$0xff]  ;;  %s1380_s30 = sshll.u32 %s2099_s29, 4  ;;  %s1381_s30 = int_to_ptr.vmem [resolvable:$true] %s1380_s30 }
  0x1e   :  { %v2159_v18 = vsub.f32 %v58_v3, %v2141_v6  ;;  %1598 = vmatprep.subr.mxu0 %v2793_v0  ;;  %v2163_v20 = vsub.f32 %v57_v7, %v2143_v10  ;;  %v2166_v21 = vsub.f32 %v56_v8, %v2145_v11  ;;  %v2178_v25 = vand.u32 4294901760, %v53_v14  ;;  %v49_v41 = vld [vmem:[#allocation5 + $0x20] sm:$0xff]  ;;  %v48_v49 = vld [vmem:[#allocation5 + $0x18] sm:$0xff]  ;;  %v47_v54 = vld [vmem:[#allocation5 + $0x10] sm:$0xff]  ;;  %s2067_s5 = scalar_lea.vmem %s1381_s30, 64  ;;  %p2072_p11 = scmp.lt.s32.totalorder %s1381_s30, %s1381_s30 }
  0x1f   :  { %1599 = vmatpush3.msra.mxu0 %v2139_v5  ;;  %v2170_v22 = vand.u32 4294901760, %v2151_v15  ;;  %v2173_v23 = vand.u32 4294901760, %v2154_v16  ;;  %v2184_v28 = vand.u32 4294901760, %v52_v19  ;;  %v2190_v30 = vsub.f32 %v55_v9, %v2147_v12  ;;  %v2237_v50 = vld [vmem:[#allocation2] sm:$0xf]  ;;  %v46_v60 = vld [vmem:[#allocation5 + $0x8] sm:$0xff]  ;;  %p2068_p10 = scmp.ne.s32.totalorder %s1381_s30, %s2067_s5  ;;  %p2073_p12 = scmp.lt.s32.totalorder %s2067_s5, %s2067_s5 }
  0x20   :  { %v2176_v24 = vand.u32 4294901760, %v2159_v18  ;;  %1600 = vmatprep.subr.mxu0 %v2793_v0  ;;  %v2182_v27 = vand.u32 4294901760, %v2163_v20  ;;  %v2187_v29 = vand.u32 4294901760, %v2166_v21  ;;  %v2200_v34 = vsub.f32 %v54_v13, %v2156_v17  ;;  %2795 = vst [vmem:[#allocation11_spill] sm:$0xff] %v2237_v50  ;;  %v45_v7 = vld [vmem:[#allocation5] sm:$0xff] }
  0x21   :  { %1601 = vmatpush3.msra.mxu0 %v2141_v6  ;;  %v156_v31 = vsub.f32 %v2151_v15, %v2170_v22  ;;  %v163_v32 = vsub.f32 %v2154_v16, %v2173_v23  ;;  %v2203_v35 = vand.u32 4294901760, %v51_v26  ;;  %v2213_v40 = vand.u32 4294901760, %v2190_v30  ;;  %p2074_p13 = por %p2073_p12, %p2072_p11 }
  0x22   :  { %v170_v33 = vsub.f32 %v2159_v18, %v2176_v24  ;;  %1602 = vmatprep.subr.mxu0 %v2793_v0  ;;  %v177_v39 = vsub.f32 %v2163_v20, %v2182_v27  ;;  %v184_v42 = vsub.f32 %v2166_v21, %v2187_v29  ;;  %v2219_v43 = vsub.f32 %v53_v14, %v2178_v25 }
  0x23   :  { %1603 = vmatpush3.msra.mxu0 %v2143_v10  ;;  %v2206_v37 = vand.u32 4294901760, %v156_v31  ;;  %v2208_v38 = vand.u32 4294901760, %v163_v32  ;;  %v2225_v45 = vand.u32 4294901760, %v50_v36  ;;  %v2228_v46 = vand.u32 4294901760, %v2200_v34  ;;  %p2075_p0 = pnand %p2074_p13, %p2068_p10 }
  0x24   :  { %1604 = vmatprep.subr.mxu0 %v2793_v0  ;;  %v2223_v44 = vand.u32 4294901760, %v170_v33  ;;  %v2231_v47 = vsub.f32 %v52_v19, %v2184_v28  ;;  %v2235_v48 = vand.u32 4294901760, %v49_v41  ;;  %v2241_v51 = vand.u32 4294901760, %v177_v39 }
  0x25   :  { %1605 = vmatpush3.msra.mxu0 %v2145_v11  ;;  %1632 = vmatpush3.msra.mxu1 %v2206_v37  ;;  %v191_v52 = vsub.f32 %v2190_v30, %v2213_v40  ;;  %v2246_v53 = vand.u32 4294901760, %v2219_v43  ;;  %v2249_v55 = vsub.f32 %v51_v26, %v2203_v35  ;;  %v2253_v56 = vand.u32 4294901760, %v184_v42 }
  0x26   :  { %1606 = vmatprep.subr.mxu0 %v2793_v0  ;;  %1633 = vmatprep.subr.mxu1 %v2793_v0  ;;  %2796 = vst [vmem:[#allocation12_spill] sm:$0xff] %v2241_v51  ;;  %v2256_v57 = vand.u32 4294901760, %v2231_v47  ;;  %v198_v58 = vsub.f32 %v2200_v34, %v2228_v46  ;;  %v2262_v59 = vand.u32 4294901760, %v48_v49  ;;  %v2265_v61 = vsub.f32 %v50_v36, %v2225_v45 }
  0x27   :  { %1607 = vmatpush3.msra.mxu0 %v2147_v12  ;;  %1634 = vmatpush3.msra.mxu1 %v2208_v38  ;;  %2797 = vst [vmem:[#allocation13_spill] sm:$0xff] %v2253_v56  ;;  %v2268_v62 = vand.u32 4294901760, %v2237_v50  ;;  %v2272_v63 = vand.u32 4294901760, %v47_v54  ;;  %v2276_v1 = vand.u32 4294901760, %v191_v52  ;;  %v205_v2 = vsub.f32 %v2219_v43, %v2246_v53 }
  0x28   :  { %1608 = vmatprep.subr.mxu0 %v2793_v0  ;;  %1635 = vmatprep.subr.mxu1 %v2793_v0  ;;  %v2281_v3 = vand.u32 4294901760, %v2249_v55  ;;  %v2284_v8 = vsub.f32 %v49_v41, %v2235_v48  ;;  %v212_v9 = vsub.f32 %v2231_v47, %v2256_v57  ;;  %v2290_v13 = vand.u32 4294901760, %v46_v60 }
  0x29   :  { %1609 = vmatpush3.msra.mxu0 %v2156_v17  ;;  %1636 = vmatpush3.msra.mxu1 %v2223_v44  ;;  %2798 = vst [vmem:[#allocation14_spill] sm:$0xff] %v2276_v1  ;;  %v2294_v14 = vand.u32 4294901760, %v198_v58  ;;  %v2297_v19 = vand.u32 4294901760, %v2265_v61  ;;  %v2301_v26 = vsub.f32 %v2237_v50, %v2268_v62  ;;  %v2304_v31 = vsub.f32 %v48_v49, %v2262_v59 }
  0x2a   :  { %1610 = vmatprep.subr.mxu0 %v2793_v0  ;;  %1637 = vmatprep.subr.mxu1 %v2793_v0  ;;  %v2308_v32 = vand.u32 4294901760, %v45_v7  ;;  %v2312_v33 = vand.u32 4294901760, %v205_v2  ;;  %v219_v36 = vsub.f32 %v2249_v55, %v2281_v3  ;;  %v2317_v39 = vand.u32 4294901760, %v2284_v8 }
  0x2b   :  { %1611 = vmatpush3.msra.mxu0 %v2178_v25  ;;  %1638 = vmatpush3.msra.mxu1 %v2241_v51  ;;  %2799 = vst [vmem:[#allocation15_spill] sm:$0xff] %v2294_v14  ;;  %v2320_v41 = vsub.f32 %v47_v54, %v2272_v63  ;;  %v2324_v42 = vand.u32 4294901760, %v212_v9  ;;  %v226_v49 = vsub.f32 %v2265_v61, %v2297_v19  ;;  %v2332_v58 = vand.u32 4294901760, %v2304_v31 }
  0x2c   :  { %1612 = vmatprep.subr.mxu0 %v2793_v0  ;;  %1639 = vmatprep.subr.mxu1 %v2793_v0  ;;  %2800 = vst [vmem:[#allocation16_spill] sm:$0xff] %v2312_v33  ;;  %v2335_v54 = vsub.f32 %v46_v60, %v2290_v13  ;;  %v2341_v2 = vand.u32 4294901760, %v219_v36  ;;  %v233_v9 = vsub.f32 %v2284_v8, %v2317_v39  ;;  %v2805_v36 = vand.u32 4294901760, %v2301_v26 }
  0x2d   :  { %1613 = vmatpush3.msra.mxu0 %v2184_v28  ;;  %1640 = vmatpush3.msra.mxu1 %v2253_v56  ;;  %2801 = vst [vmem:[#allocation17_spill] sm:$0xff] %v2324_v42  ;;  %2802 = vst [vmem:[#allocation18_spill] sm:$0xff] %v2332_v58  ;;  %v2346_v52 = vand.u32 4294901760, %v2320_v41  ;;  %v2349_v50 = vsub.f32 %v45_v7, %v2308_v32  ;;  %v2355_v60 = vand.u32 4294901760, %v226_v49 }
  0x2e   :  { %1614 = vmatprep.subr.mxu0 %v2793_v0  ;;  %1641 = vmatprep.subr.mxu1 %v2793_v0  ;;  %2803 = vst [vmem:[#allocation19_spill] sm:$0xff] %v2341_v2  ;;  %v2363_v7 = vand.u32 4294901760, %v2335_v54  ;;  %v2369_v49 = vand.u32 4294901760, %v233_v9 }
  0x2f   :  { %1615 = vmatpush3.msra.mxu0 %v2203_v35  ;;  %1642 = vmatpush3.msra.mxu1 %v2276_v1  ;;  %2804 = vst [vmem:[#allocation20_spill] sm:$0xff] %v2346_v52 }
  0x30   :  { %1616 = vmatprep.subr.mxu0 %v2793_v0  ;;  %1643 = vmatprep.subr.mxu1 %v2793_v0  ;;  %2806 = vst [vmem:[#allocation21_spill] sm:$0xff] %v2363_v7  ;;  %v254_v9 = vsub.f32 %v2335_v54, %v2363_v7 }
  0x31   :  { %1617 = vmatpush3.msra.mxu0 %v2225_v45  ;;  %1644 = vmatpush3.msra.mxu1 %v2294_v14  ;;  %v240_v14 = vsub.f32 %v2304_v31, %v2332_v58 }
  0x32   :  { %1618 = vmatprep.subr.mxu0 %v2793_v0  ;;  %1645 = vmatprep.subr.mxu1 %v2793_v0 }
  0x33   :  { %1619 = vmatpush3.msra.mxu0 %v2235_v48  ;;  %1646 = vmatpush3.msra.mxu1 %v2312_v33  ;;  %v145_v33 = vsub.f32 %v2301_v26, %v2805_v36  ;;  %v2374_v36 = vand.u32 4294901760, %v2349_v50  ;;  %v2380_v56 = vand.u32 4294901760, %v240_v14  ;;  %v2395_v14 = vand.u32 4294901760, %v254_v9 }
  0x34   :  { %1620 = vmatprep.subr.mxu0 %v2793_v0  ;;  %1647 = vmatprep.subr.mxu1 %v2793_v0 }
  0x35   :  { %1621 = vmatpush3.msra.mxu0 %v2262_v59  ;;  %1648 = vmatpush3.msra.mxu1 %v2324_v42  ;;  %v247_v42 = vsub.f32 %v2320_v41, %v2346_v52  ;;  %2807 = vst [vmem:[#allocation22_spill] sm:$0xff] %v2374_v36  ;;  %v146_v1 = vand.u32 4294901760, %v145_v33  ;;  %v261_v51 = vsub.f32 %v2349_v50, %v2374_v36 }
  0x36   :  { %1622 = vmatprep.subr.mxu0 %v2793_v0  ;;  %1649 = vmatprep.subr.mxu1 %v2793_v0 }
  0x37   :  { %1623 = vmatpush3.msra.mxu0 %v2272_v63  ;;  %1650 = vmatpush3.msra.mxu1 %v2341_v2  ;;  %v2388_v2 = vand.u32 4294901760, %v247_v42  ;;  %v2401_v33 = vand.u32 4294901760, %v261_v51  ;;  %v2808_v51 = vand.u32 4294901760, %v2301_v26  ;;  %v2815_v42 = vld [vmem:[#allocation19_spill] sm:$0xff] }
  0x38   :  { %1624 = vmatprep.subr.mxu0 %v2793_v0  ;;  %1651 = vmatprep.subr.mxu1 %v2793_v0 }
  0x39   :  { %1625 = vmatpush3.msra.mxu0 %v2290_v13  ;;  %1652 = vmatpush3.msra.mxu1 %v2355_v60 }
  0x3a   :  { %1626 = vmatprep.subr.mxu0 %v2793_v0  ;;  %1653 = vmatprep.subr.mxu1 %v2793_v0 }
  0x3b   :  { %1627 = vmatpush3.msra.mxu0 %v2308_v32  ;;  %1654 = vmatpush3.msra.mxu1 %v2369_v49 }
  0x3c   :  { %1655 = vmatprep.subr.mxu1 %v2793_v0  ;;  %1666 = vmatprep.subr.mxu0 %v2793_v0 }
  0x3d   :  { %1629 = vmatmul.mubr.f32.vlgmr.msra.gmra.mxu0 %v146_v1  ;;  %1656 = vmatpush3.msra.mxu1 %v2380_v56  ;;  %v2813_v1 = vld [vmem:[#allocation16_spill] sm:$0xff] }
  0x3e   :  { %1667 = vmatpush3.msra.mxu0 %v2151_v15  ;;  %1657 = vmatprep.subr.mxu1 %v2793_v0 }
  0x3f   :  { %1668 = vmatprep.subr.mxu0 %v2793_v0  ;;  %1658 = vmatpush3.msra.mxu1 %v2388_v2 }
  0x40   :  { %1669 = vmatpush3.msra.mxu0 %v2154_v16  ;;  %1659 = vmatprep.subr.mxu1 %v2793_v0 }
  0x41   :  { %1670 = vmatprep.subr.mxu0 %v2793_v0  ;;  %1660 = vmatpush3.msra.mxu1 %v2395_v14 }
  0x42   :  { %1671 = vmatpush3.msra.mxu0 %v2159_v18  ;;  %1661 = vmatprep.subr.mxu1 %v2793_v0 }
  0x43   :  { %1672 = vmatprep.subr.mxu0 %v2793_v0  ;;  %1662 = vmatpush3.msra.mxu1 %v2401_v33 }
  0x44   :  { %1673 = vmatpush3.msra.mxu0 %v2163_v20  ;;  %1664 = vmatmul.mubr.f32.vlgmr.msra.gmra.mxu1 %v2268_v62 }
  0x45   :  { %1674 = vmatprep.subr.mxu0 %v2793_v0  ;;  %1701 = vmatprep.subr.mxu1 %v2793_v0 }
  0x46   :  { %1675 = vmatpush3.msra.mxu0 %v2166_v21  ;;  %1702 = vmatpush3.msra.mxu1 %v2137_v4 }
  0x47   :  { %1676 = vmatprep.subr.mxu0 %v2793_v0  ;;  %1703 = vmatprep.subr.mxu1 %v2793_v0 }
  0x48   :  { %1677 = vmatpush3.msra.mxu0 %v2190_v30  ;;  %1704 = vmatpush3.msra.mxu1 %v2139_v5 }
  0x49   :  { %1678 = vmatprep.subr.mxu0 %v2793_v0  ;;  %1705 = vmatprep.subr.mxu1 %v2793_v0 }
  0x4a   :  { %1679 = vmatpush3.msra.mxu0 %v2200_v34  ;;  %1706 = vmatpush3.msra.mxu1 %v2141_v6 }
  0x4b   :  { %1680 = vmatprep.subr.mxu0 %v2793_v0  ;;  %1707 = vmatprep.subr.mxu1 %v2793_v0 }
  0x4c   :  { %1681 = vmatpush3.msra.mxu0 %v2219_v43  ;;  %1708 = vmatpush3.msra.mxu1 %v2143_v10 }
  0x4d   :  { %1682 = vmatprep.subr.mxu0 %v2793_v0  ;;  %1709 = vmatprep.subr.mxu1 %v2793_v0 }
  0x4e   :  { %1683 = vmatpush3.msra.mxu0 %v2231_v47  ;;  %1710 = vmatpush3.msra.mxu1 %v2145_v11 }
  0x4f   :  { %1684 = vmatprep.subr.mxu0 %v2793_v0  ;;  %1711 = vmatprep.subr.mxu1 %v2793_v0 }
  0x50   :  { %1685 = vmatpush3.msra.mxu0 %v2249_v55  ;;  %1712 = vmatpush3.msra.mxu1 %v2147_v12 }
  0x51   :  { %1686 = vmatprep.subr.mxu0 %v2793_v0  ;;  %1713 = vmatprep.subr.mxu1 %v2793_v0 }
  0x52   :  { %1687 = vmatpush3.msra.mxu0 %v2265_v61  ;;  %1714 = vmatpush3.msra.mxu1 %v2156_v17 }
  0x53   :  { %1688 = vmatprep.subr.mxu0 %v2793_v0  ;;  %1715 = vmatprep.subr.mxu1 %v2793_v0 }
  0x54   :  { %1689 = vmatpush3.msra.mxu0 %v2284_v8  ;;  %1716 = vmatpush3.msra.mxu1 %v2178_v25 }
  0x55   :  { %1690 = vmatprep.subr.mxu0 %v2793_v0  ;;  %1717 = vmatprep.subr.mxu1 %v2793_v0 }
  0x56   :  { %1691 = vmatpush3.msra.mxu0 %v2304_v31  ;;  %1718 = vmatpush3.msra.mxu1 %v2184_v28 }
  0x57   :  { %1692 = vmatprep.subr.mxu0 %v2793_v0  ;;  %1719 = vmatprep.subr.mxu1 %v2793_v0 }
  0x58   :  { %1693 = vmatpush3.msra.mxu0 %v2320_v41  ;;  %1720 = vmatpush3.msra.mxu1 %v2203_v35 }
  0x59   :  { %1694 = vmatprep.subr.mxu0 %v2793_v0  ;;  %1721 = vmatprep.subr.mxu1 %v2793_v0 }
  0x5a   :  { %1695 = vmatpush3.msra.mxu0 %v2335_v54  ;;  %1722 = vmatpush3.msra.mxu1 %v2225_v45 }
  0x5b   :  { %1696 = vmatprep.subr.mxu0 %v2793_v0  ;;  %1723 = vmatprep.subr.mxu1 %v2793_v0 }
  0x5c   :  { %1697 = vmatpush3.msra.mxu0 %v2349_v50  ;;  %1698 = vmatprep.mubr.msk.f32.mxu0 %vm2098_vm0, %v2793_v0 }
  0x5d   :  { %1724 = vmatpush3.msra.mxu1 %v2235_v48  ;;  %1699 = vmatmul.mubr.f32.vlgmr.msra.gmra.mxu0 %v2301_v26  ;;  %v2814_v26 = vld [vmem:[#allocation17_spill] sm:$0xff] }
  0x5e   :  { %1725 = vmatprep.subr.mxu1 %v2793_v0  ;;  %1736 = vmatprep.subr.mxu0 %v2793_v0 }
  0x5f   :  { %1726 = vmatpush3.msra.mxu1 %v2262_v59  ;;  %1737 = vmatpush3.msra.mxu0 %v2170_v22 }
  0x60   :  { %1727 = vmatprep.subr.mxu1 %v2793_v0  ;;  %1738 = vmatprep.subr.mxu0 %v2793_v0 }
  0x61   :  { %1728 = vmatpush3.msra.mxu1 %v2272_v63  ;;  %1739 = vmatpush3.msra.mxu0 %v2173_v23 }
  0x62   :  { %1729 = vmatprep.subr.mxu1 %v2793_v0  ;;  %1740 = vmatprep.subr.mxu0 %v2793_v0 }
  0x63   :  { %1730 = vmatpush3.msra.mxu1 %v2290_v13  ;;  %1741 = vmatpush3.msra.mxu0 %v2176_v24 }
  0x64   :  { %1731 = vmatprep.subr.mxu1 %v2793_v0  ;;  %1742 = vmatprep.subr.mxu0 %v2793_v0 }
  0x65   :  { %1732 = vmatpush3.msra.mxu1 %v2308_v32  ;;  %1733 = vmatprep.mubr.msk.f32.mxu1 %vm2098_vm0, %v2793_v0 }
  0x66   :  { %1743 = vmatpush3.msra.mxu0 %v2182_v27  ;;  %1734 = vmatmul.mubr.f32.vlgmr.msra.gmra.mxu1 %v2808_v51 }
  0x67   :  { %1744 = vmatprep.subr.mxu0 %v2793_v0  ;;  %1771 = vmatprep.subr.mxu1 %v2793_v0 }
  0x68   :  { %1745 = vmatpush3.msra.mxu0 %v2187_v29  ;;  %1772 = vmatpush3.msra.mxu1 %v2137_v4 }
  0x69   :  { %1746 = vmatprep.subr.mxu0 %v2793_v0  ;;  %1773 = vmatprep.subr.mxu1 %v2793_v0 }
  0x6a   :  { %1747 = vmatpush3.msra.mxu0 %v2213_v40  ;;  %1774 = vmatpush3.msra.mxu1 %v2139_v5 }
  0x6b   :  { %1748 = vmatprep.subr.mxu0 %v2793_v0  ;;  %1775 = vmatprep.subr.mxu1 %v2793_v0 }
  0x6c   :  { %1749 = vmatpush3.msra.mxu0 %v2228_v46  ;;  %1776 = vmatpush3.msra.mxu1 %v2141_v6 }
  0x6d   :  { %1750 = vmatprep.subr.mxu0 %v2793_v0  ;;  %1777 = vmatprep.subr.mxu1 %v2793_v0 }
  0x6e   :  { %1751 = vmatpush3.msra.mxu0 %v2246_v53  ;;  %1778 = vmatpush3.msra.mxu1 %v2143_v10 }
  0x6f   :  { %1752 = vmatprep.subr.mxu0 %v2793_v0  ;;  %1779 = vmatprep.subr.mxu1 %v2793_v0 }
  0x70   :  { %1753 = vmatpush3.msra.mxu0 %v2256_v57  ;;  %1780 = vmatpush3.msra.mxu1 %v2145_v11 }
  0x71   :  { %1754 = vmatprep.subr.mxu0 %v2793_v0  ;;  %1781 = vmatprep.subr.mxu1 %v2793_v0 }
  0x72   :  { %1755 = vmatpush3.msra.mxu0 %v2281_v3  ;;  %1782 = vmatpush3.msra.mxu1 %v2147_v12 }
  0x73   :  { %1756 = vmatprep.subr.mxu0 %v2793_v0  ;;  %1783 = vmatprep.subr.mxu1 %v2793_v0 }
  0x74   :  { %1757 = vmatpush3.msra.mxu0 %v2297_v19  ;;  %1784 = vmatpush3.msra.mxu1 %v2156_v17 }
  0x75   :  { %1758 = vmatprep.subr.mxu0 %v2793_v0  ;;  %1785 = vmatprep.subr.mxu1 %v2793_v0 }
  0x76   :  { %1759 = vmatpush3.msra.mxu0 %v2317_v39  ;;  %1786 = vmatpush3.msra.mxu1 %v2178_v25 }
  0x77   :  { %1760 = vmatprep.subr.mxu0 %v2793_v0  ;;  %1787 = vmatprep.subr.mxu1 %v2793_v0 }
  0x78   :  { %1761 = vmatpush3.msra.mxu0 %v2332_v58  ;;  %1788 = vmatpush3.msra.mxu1 %v2184_v28  ;;  %v2816_v58 = vld [vmem:[#allocation11_spill] sm:$0xff] }
  0x79   :  { %1762 = vmatprep.subr.mxu0 %v2793_v0  ;;  %1789 = vmatprep.subr.mxu1 %v2793_v0 }
  0x7a   :  { %1763 = vmatpush3.msra.mxu0 %v2346_v52  ;;  %1790 = vmatpush3.msra.mxu1 %v2203_v35 }
  0x7b   :  { %1764 = vmatprep.subr.mxu0 %v2793_v0  ;;  %1791 = vmatprep.subr.mxu1 %v2793_v0 }
  0x7c   :  { %1765 = vmatpush3.msra.mxu0 %v2363_v7  ;;  %1792 = vmatpush3.msra.mxu1 %v2225_v45 }
  0x7d   :  { %1766 = vmatprep.subr.mxu0 %v2793_v0  ;;  %1793 = vmatprep.subr.mxu1 %v2793_v0 }
  0x7e   :  { %1767 = vmatpush3.msra.mxu0 %v2374_v36  ;;  %1768 = vmatprep.mubr.msk.f32.mxu0 %vm2098_vm0, %v2793_v0 }
  0x7f   :  { %1794 = vmatpush3.msra.mxu1 %v2235_v48  ;;  %1769 = vmatmul.mubr.f32.vlgmr.msra.gmra.mxu0 %v2268_v62 }
  0x80   :  { %1795 = vmatprep.subr.mxu1 %v2793_v0  ;;  %1803 = vmatprep.mubr.msk.f32.mxu1 %vm2098_vm0, %v2793_v0 }
  0x81   :  { %1796 = vmatpush3.msra.mxu1 %v2262_v59  ;;  %1806 = vmatprep.subr.mxu0 %v2793_v0 }
  0x82   :  { %1797 = vmatprep.subr.mxu1 %v2793_v0  ;;  %1807 = vmatpush3.msra.mxu0 %v2137_v4 }
  0x83   :  { %1798 = vmatpush3.msra.mxu1 %v2272_v63  ;;  %1808 = vmatprep.subr.mxu0 %v2793_v0 }
  0x84   :  { %1799 = vmatprep.subr.mxu1 %v2793_v0  ;;  %1809 = vmatpush3.msra.mxu0 %v2139_v5 }
  0x85   :  { %1800 = vmatpush3.msra.mxu1 %v2290_v13  ;;  %1810 = vmatprep.subr.mxu0 %v2793_v0 }
  0x86   :  { %1801 = vmatprep.subr.mxu1 %v2793_v0  ;;  %1811 = vmatpush3.msra.mxu0 %v2141_v6 }
  0x87   :  { %1802 = vmatpush3.msra.mxu1 %v2308_v32  ;;  %1812 = vmatprep.subr.mxu0 %v2793_v0 }
  0x88   :  { %1804 = vmatmul.mubr.f32.vlgmr.msra.gmra.mxu1 %v2268_v62  ;;  %1841 = vmatprep.subr.mxu1 %v2793_v0  ;;  %v2812_v62 = vld [vmem:[#allocation15_spill] sm:$0xff] }
  0x89   :  { %1842 = vmatpush3.msra.mxu1 %v2206_v37  ;;  %1813 = vmatpush3.msra.mxu0 %v2143_v10  ;;  %v2809_v37 = vld [vmem:[#allocation12_spill] sm:$0xff] }
  0x8a   :  { %1843 = vmatprep.subr.mxu1 %v2793_v0  ;;  %1814 = vmatprep.subr.mxu0 %v2793_v0 }
  0x8b   :  { %1844 = vmatpush3.msra.mxu1 %v2208_v38  ;;  %1815 = vmatpush3.msra.mxu0 %v2145_v11  ;;  %v2810_v38 = vld [vmem:[#allocation13_spill] sm:$0xff] }
  0x8c   :  { %1845 = vmatprep.subr.mxu1 %v2793_v0  ;;  %1816 = vmatprep.subr.mxu0 %v2793_v0 }
  0x8d   :  { %1846 = vmatpush3.msra.mxu1 %v2223_v44  ;;  %1817 = vmatpush3.msra.mxu0 %v2147_v12  ;;  %v2811_v44 = vld [vmem:[#allocation14_spill] sm:$0xff] }
  0x8e   :  { %1847 = vmatprep.subr.mxu1 %v2793_v0  ;;  %1818 = vmatprep.subr.mxu0 %v2793_v0 }
  0x8f   :  { %1848 = vmatpush3.msra.mxu1 %v2809_v37  ;;  %1819 = vmatpush3.msra.mxu0 %v2156_v17 }
  0x90   :  { %1849 = vmatprep.subr.mxu1 %v2793_v0  ;;  %1820 = vmatprep.subr.mxu0 %v2793_v0 }
  0x91   :  { %1850 = vmatpush3.msra.mxu1 %v2810_v38  ;;  %1821 = vmatpush3.msra.mxu0 %v2178_v25 }
  0x92   :  { %1851 = vmatprep.subr.mxu1 %v2793_v0  ;;  %1822 = vmatprep.subr.mxu0 %v2793_v0 }
  0x93   :  { %1852 = vmatpush3.msra.mxu1 %v2811_v44  ;;  %1823 = vmatpush3.msra.mxu0 %v2184_v28 }
  0x94   :  { %1853 = vmatprep.subr.mxu1 %v2793_v0  ;;  %1824 = vmatprep.subr.mxu0 %v2793_v0 }
  0x95   :  { %1854 = vmatpush3.msra.mxu1 %v2812_v62  ;;  %1825 = vmatpush3.msra.mxu0 %v2203_v35 }
  0x96   :  { %1855 = vmatprep.subr.mxu1 %v2793_v0  ;;  %1826 = vmatprep.subr.mxu0 %v2793_v0 }
  0x97   :  { %1856 = vmatpush3.msra.mxu1 %v2813_v1  ;;  %1827 = vmatpush3.msra.mxu0 %v2225_v45 }
  0x98   :  { %1857 = vmatprep.subr.mxu1 %v2793_v0  ;;  %1828 = vmatprep.subr.mxu0 %v2793_v0 }
  0x99   :  { %1858 = vmatpush3.msra.mxu1 %v2814_v26  ;;  %1829 = vmatpush3.msra.mxu0 %v2235_v48 }
  0x9a   :  { %1859 = vmatprep.subr.mxu1 %v2793_v0  ;;  %1830 = vmatprep.subr.mxu0 %v2793_v0 }
  0x9b   :  { %1860 = vmatpush3.msra.mxu1 %v2815_v42  ;;  %1873 = vmatprep.mubr.msk.f32.mxu1 %vm2098_vm0, %v2793_v0 }
  0x9c   :  { %1861 = vmatprep.subr.mxu1 %v2793_v0  ;;  %1831 = vmatpush3.msra.mxu0 %v2262_v59 }
  0x9d   :  { %1862 = vmatpush3.msra.mxu1 %v2355_v60  ;;  %1832 = vmatprep.subr.mxu0 %v2793_v0 }
  0x9e   :  { %1863 = vmatprep.subr.mxu1 %v2793_v0  ;;  %1833 = vmatpush3.msra.mxu0 %v2272_v63 }
  0x9f   :  { %1864 = vmatpush3.msra.mxu1 %v2369_v49  ;;  %1834 = vmatprep.subr.mxu0 %v2793_v0 }
  0xa0   :  { %1865 = vmatprep.subr.mxu1 %v2793_v0  ;;  %1835 = vmatpush3.msra.mxu0 %v2290_v13 }
  0xa1   :  { %1866 = vmatpush3.msra.mxu1 %v2380_v56  ;;  %1836 = vmatprep.subr.mxu0 %v2793_v0 }
  0xa2   :  { %1867 = vmatprep.subr.mxu1 %v2793_v0  ;;  %1837 = vmatpush3.msra.mxu0 %v2308_v32 }
  0xa3   :  { %1868 = vmatpush3.msra.mxu1 %v2388_v2  ;;  %1838 = vmatprep.mubr.msk.f32.mxu0 %vm2098_vm0, %v2793_v0 }
  0xa4   :  { %1869 = vmatprep.subr.mxu1 %v2793_v0  ;;  %1876 = vmatprep.subr.mxu0 %v2793_v0 }
  0xa5   :  { %1870 = vmatpush3.msra.mxu1 %v2395_v14 }
  0xa6   :  { %1871 = vmatprep.subr.mxu1 %v2793_v0 }
  0xa7   :  { %1872 = vmatpush3.msra.mxu1 %v2401_v33 }
  0xa8   :  { %1911 = vmatprep.subr.mxu1 %v2793_v0 }
  0xfd   :  { %v148_v56 = vpop.f32.mrf.mxu0 }
  0xff   :  { %v1630_v60 = vpop.f32.mrf.mxu0 }
 0x104   :  { %v299_v49 = vpop.f32.mrf.mxu1 }
 0x105   :  { %v300_v62 = vadd.f32 %v299_v49, %v148_v56  ;;  %v2817_v56 = vmov 0.0  }
 0x106   :  { %v1665_v9 = vpop.f32.mrf.mxu1 }
 0x11d   :  { %v403_v2 = vpop.f32.mrf.mxu0 }
 0x11e   :  { %v404_v26 = vadd.f32 %v403_v2, %v300_v62 }
 0x11f   :  { %v1700_v51 = vpop.f32.mrf.mxu0 }
 0x126   :  { %v492_v37 = vpop.f32.mrf.mxu1 }
 0x127   :  { %v493_v42 = vadd.f32 %v492_v37, %v404_v26 }
 0x128   :  { %v1735_v38 = vpop.f32.mrf.mxu1 }
 0x13f   :  { %v611_v44 = vpop.f32.mrf.mxu0 }
 0x140   :  { %v612_v14 = vadd.f32 %v611_v44, %v493_v42 }
 0x141   :  { %v1770_v1 = vpop.f32.mrf.mxu0 }
 0x148   :  { %v698_v36 = vpop.f32.mrf.mxu1 }
 0x149   :  { %v699_v7 = vadd.f32 %v698_v36, %v612_v14 }
 0x14a   :  { %v1805_v52 = vpop.f32.mrf.mxu1 }
 0x14b   :  { %v702_v33 = vmul.f32 0.03125, %v699_v7 }
 0x14d   :  { %v2617_v0 = vsub.f32 %v2816_v58, %v702_v33 }
 0x14f   :  { %v704_v60 = vmul.f32 %v2617_v0, %v2617_v0 }
 0x151   :  { %v2621_v9 = vand.u32 4294901760, %v704_v60 }
 0x153   :  { %v2624_v51 = vsub.f32 %v704_v60, %v2621_v9  ;;  %1874 = vmatmul.mubr.f32.vlgmr.msra.gmra.mxu1 %v2621_v9 }
 0x154   :  { %1912 = vmatpush3.msra.mxu1 %v2137_v4  ;;  %1943 = vmatprep.mubr.msk.f32.mxu1 %vm2098_vm0, %v2817_v56 }
 0x155   :  { %1913 = vmatprep.subr.mxu1 %v2817_v56  ;;  %v788_v52 = vand.u32 4294901760, %v2624_v51 }
 0x156   :  { %1914 = vmatpush3.msra.mxu1 %v2139_v5 }
 0x157   :  { %1915 = vmatprep.subr.mxu1 %v2817_v56  ;;  %v789_v58 = vsub.f32 %v2624_v51, %v788_v52 }
 0x158   :  { %1916 = vmatpush3.msra.mxu1 %v2141_v6 }
 0x159   :  { %1917 = vmatprep.subr.mxu1 %v2817_v56  ;;  %v790_v7 = vand.u32 4294901760, %v789_v58 }
 0x15a   :  { %1918 = vmatpush3.msra.mxu1 %v2143_v10 }
 0x15b   :  { %1919 = vmatprep.subr.mxu1 %v2817_v56  ;;  %1839 = vmatmul.mubr.f32.vlgmr.msra.gmra.mxu0 %v790_v7 }
 0x15c   :  { %1877 = vmatpush3.msra.mxu0 %v2151_v15  ;;  %1920 = vmatpush3.msra.mxu1 %v2145_v11 }
 0x15d   :  { %1878 = vmatprep.subr.mxu0 %v2817_v56  ;;  %1921 = vmatprep.subr.mxu1 %v2817_v56 }
 0x15e   :  { %1879 = vmatpush3.msra.mxu0 %v2154_v16  ;;  %1922 = vmatpush3.msra.mxu1 %v2147_v12 }
 0x15f   :  { %1880 = vmatprep.subr.mxu0 %v2817_v56  ;;  %1923 = vmatprep.subr.mxu1 %v2817_v56 }
 0x160   :  { %1881 = vmatpush3.msra.mxu0 %v2159_v18  ;;  %1924 = vmatpush3.msra.mxu1 %v2156_v17 }
 0x161   :  { %1882 = vmatprep.subr.mxu0 %v2817_v56  ;;  %1925 = vmatprep.subr.mxu1 %v2817_v56 }
 0x162   :  { %1883 = vmatpush3.msra.mxu0 %v2163_v20  ;;  %1926 = vmatpush3.msra.mxu1 %v2178_v25 }
 0x163   :  { %1884 = vmatprep.subr.mxu0 %v2817_v56  ;;  %1927 = vmatprep.subr.mxu1 %v2817_v56 }
 0x164   :  { %1885 = vmatpush3.msra.mxu0 %v2166_v21  ;;  %1928 = vmatpush3.msra.mxu1 %v2184_v28 }
 0x165   :  { %1886 = vmatprep.subr.mxu0 %v2817_v56  ;;  %1929 = vmatprep.subr.mxu1 %v2817_v56 }
 0x166   :  { %1887 = vmatpush3.msra.mxu0 %v2190_v30  ;;  %1930 = vmatpush3.msra.mxu1 %v2203_v35 }
 0x167   :  { %1888 = vmatprep.subr.mxu0 %v2817_v56  ;;  %1931 = vmatprep.subr.mxu1 %v2817_v56 }
 0x168   :  { %1889 = vmatpush3.msra.mxu0 %v2200_v34  ;;  %1932 = vmatpush3.msra.mxu1 %v2225_v45 }
 0x169   :  { %1890 = vmatprep.subr.mxu0 %v2817_v56  ;;  %1933 = vmatprep.subr.mxu1 %v2817_v56 }
 0x16a   :  { %1891 = vmatpush3.msra.mxu0 %v2219_v43  ;;  %1934 = vmatpush3.msra.mxu1 %v2235_v48 }
 0x16b   :  { %1892 = vmatprep.subr.mxu0 %v2817_v56  ;;  %1935 = vmatprep.subr.mxu1 %v2817_v56 }
 0x16c   :  { %1893 = vmatpush3.msra.mxu0 %v2231_v47  ;;  %1936 = vmatpush3.msra.mxu1 %v2262_v59 }
 0x16d   :  { %1894 = vmatprep.subr.mxu0 %v2817_v56  ;;  %1937 = vmatprep.subr.mxu1 %v2817_v56 }
 0x16e   :  { %1895 = vmatpush3.msra.mxu0 %v2249_v55  ;;  %1938 = vmatpush3.msra.mxu1 %v2272_v63 }
 0x16f   :  { %1896 = vmatprep.subr.mxu0 %v2817_v56  ;;  %1939 = vmatprep.subr.mxu1 %v2817_v56 }
 0x170   :  { %1897 = vmatpush3.msra.mxu0 %v2265_v61  ;;  %1940 = vmatpush3.msra.mxu1 %v2290_v13 }
 0x171   :  { %1898 = vmatprep.subr.mxu0 %v2817_v56  ;;  %1941 = vmatprep.subr.mxu1 %v2817_v56 }
 0x172   :  { %1899 = vmatpush3.msra.mxu0 %v2284_v8  ;;  %1942 = vmatpush3.msra.mxu1 %v2308_v32 }
 0x173   :  { %1900 = vmatprep.subr.mxu0 %v2817_v56  ;;  %1944 = vmatmul.mubr.f32.vlgmr.msra.gmra.mxu1 %v788_v52 }
 0x174   :  { %1981 = vmatprep.subr.mxu1 %v2817_v56  ;;  %1901 = vmatpush3.msra.mxu0 %v2304_v31 }
 0x175   :  { %1982 = vmatpush3.msra.mxu1 %v2137_v4  ;;  %1902 = vmatprep.subr.mxu0 %v2817_v56  ;;  %v2818_v4 = vld [vmem:[#allocation18_spill] sm:$0xff] }
 0x176   :  { %1983 = vmatprep.subr.mxu1 %v2817_v56  ;;  %1903 = vmatpush3.msra.mxu0 %v2320_v41 }
 0x177   :  { %1984 = vmatpush3.msra.mxu1 %v2139_v5  ;;  %1904 = vmatprep.subr.mxu0 %v2817_v56  ;;  %v2819_v5 = vld [vmem:[#allocation20_spill] sm:$0xff] }
 0x178   :  { %1985 = vmatprep.subr.mxu1 %v2817_v56  ;;  %1905 = vmatpush3.msra.mxu0 %v2335_v54 }
 0x179   :  { %1986 = vmatpush3.msra.mxu1 %v2141_v6  ;;  %1906 = vmatprep.subr.mxu0 %v2817_v56  ;;  %v2820_v6 = vld [vmem:[#allocation21_spill] sm:$0xff] }
 0x17a   :  { %1987 = vmatprep.subr.mxu1 %v2817_v56  ;;  %1907 = vmatpush3.msra.mxu0 %v2349_v50 }
 0x17b   :  { %1908 = vmatprep.mubr.msk.f32.mxu0 %vm2098_vm0, %v2817_v56  ;;  %1988 = vmatpush3.msra.mxu1 %v2143_v10  ;;  %v2821_v10 = vld [vmem:[#allocation22_spill] sm:$0xff] }
 0x17c   :  { %1909 = vmatmul.mubr.f32.vlgmr.msra.gmra.mxu0 %v2624_v51  ;;  %1946 = vmatprep.subr.mxu0 %v2817_v56 }
 0x17d   :  { %1989 = vmatprep.subr.mxu1 %v2817_v56  ;;  %1947 = vmatpush3.msra.mxu0 %v2170_v22 }
 0x17e   :  { %1990 = vmatpush3.msra.mxu1 %v2145_v11  ;;  %1948 = vmatprep.subr.mxu0 %v2817_v56 }
 0x17f   :  { %1991 = vmatprep.subr.mxu1 %v2817_v56  ;;  %1949 = vmatpush3.msra.mxu0 %v2173_v23 }
 0x180   :  { %1992 = vmatpush3.msra.mxu1 %v2147_v12  ;;  %1950 = vmatprep.subr.mxu0 %v2817_v56 }
 0x181   :  { %1993 = vmatprep.subr.mxu1 %v2817_v56  ;;  %1951 = vmatpush3.msra.mxu0 %v2176_v24 }
 0x182   :  { %1994 = vmatpush3.msra.mxu1 %v2156_v17  ;;  %1952 = vmatprep.subr.mxu0 %v2817_v56 }
 0x183   :  { %1995 = vmatprep.subr.mxu1 %v2817_v56  ;;  %1953 = vmatpush3.msra.mxu0 %v2182_v27 }
 0x184   :  { %1996 = vmatpush3.msra.mxu1 %v2178_v25  ;;  %1954 = vmatprep.subr.mxu0 %v2817_v56 }
 0x185   :  { %1997 = vmatprep.subr.mxu1 %v2817_v56  ;;  %1955 = vmatpush3.msra.mxu0 %v2187_v29 }
 0x186   :  { %1998 = vmatpush3.msra.mxu1 %v2184_v28  ;;  %1956 = vmatprep.subr.mxu0 %v2817_v56 }
 0x187   :  { %1999 = vmatprep.subr.mxu1 %v2817_v56  ;;  %1957 = vmatpush3.msra.mxu0 %v2213_v40 }
 0x188   :  { %2000 = vmatpush3.msra.mxu1 %v2203_v35  ;;  %1958 = vmatprep.subr.mxu0 %v2817_v56 }
 0x189   :  { %2001 = vmatprep.subr.mxu1 %v2817_v56  ;;  %1959 = vmatpush3.msra.mxu0 %v2228_v46 }
 0x18a   :  { %2002 = vmatpush3.msra.mxu1 %v2225_v45  ;;  %1960 = vmatprep.subr.mxu0 %v2817_v56 }
 0x18b   :  { %2003 = vmatprep.subr.mxu1 %v2817_v56  ;;  %1961 = vmatpush3.msra.mxu0 %v2246_v53  ;;  %v1390_v53 = vld [vmem:[%s2778_s2] ss:$0 sm:$0xff] }
 0x18c   :  { %2004 = vmatpush3.msra.mxu1 %v2235_v48  ;;  %1962 = vmatprep.subr.mxu0 %v2817_v56 }
 0x18d   :  { %2005 = vmatprep.subr.mxu1 %v2817_v56  ;;  %1963 = vmatpush3.msra.mxu0 %v2256_v57  ;;  %v1391_v57 = vld [vmem:[%s2779_s3] ss:$0 sm:$0xff] }
 0x18e   :  { %2006 = vmatpush3.msra.mxu1 %v2262_v59  ;;  %1964 = vmatprep.subr.mxu0 %v2817_v56 }
 0x18f   :  { %2007 = vmatprep.subr.mxu1 %v2817_v56  ;;  %1965 = vmatpush3.msra.mxu0 %v2281_v3 }
 0x190   :  { %2008 = vmatpush3.msra.mxu1 %v2272_v63  ;;  %1966 = vmatprep.subr.mxu0 %v2817_v56 }
 0x191   :  { %2009 = vmatprep.subr.mxu1 %v2817_v56  ;;  %1967 = vmatpush3.msra.mxu0 %v2297_v19 }
 0x192   :  { %2010 = vmatpush3.msra.mxu1 %v2290_v13  ;;  %1968 = vmatprep.subr.mxu0 %v2817_v56 }
 0x193   :  { %2011 = vmatprep.subr.mxu1 %v2817_v56  ;;  %1969 = vmatpush3.msra.mxu0 %v2317_v39 }
 0x194   :  { %2012 = vmatpush3.msra.mxu1 %v2308_v32  ;;  %2013 = vmatprep.mubr.msk.f32.mxu1 %vm2098_vm0, %v2817_v56 }
 0x195   :  { %1970 = vmatprep.subr.mxu0 %v2817_v56  ;;  %2014 = vmatmul.mubr.f32.vlgmr.msra.gmra.mxu1 %v2621_v9 }
 0x196   :  { %1971 = vmatpush3.msra.mxu0 %v2818_v4  ;;  %1978 = vmatprep.mubr.msk.f32.mxu0 %vm2098_vm0, %v2817_v56 }
 0x197   :  { %1972 = vmatprep.subr.mxu0 %v2817_v56 }
 0x198   :  { %1973 = vmatpush3.msra.mxu0 %v2819_v5 }
 0x199   :  { %1974 = vmatprep.subr.mxu0 %v2817_v56 }
 0x19a   :  { %1975 = vmatpush3.msra.mxu0 %v2820_v6 }
 0x19b   :  { %1976 = vmatprep.subr.mxu0 %v2817_v56 }
 0x19c   :  { %1977 = vmatpush3.msra.mxu0 %v2821_v10 }
 0x19d   :  { %1979 = vmatmul.mubr.f32.vlgmr.msra.gmra.mxu0 %v2621_v9 }
 0x213   :  { %v943_v11 = vpop.f32.mrf.mxu1 }
 0x215   :  { %v1875_v12 = vpop.f32.mrf.mxu1 }
 0x21b   :  { %v792_v15 = vpop.f32.mrf.mxu0 }
 0x21c   :  { %v944_v23 = vadd.f32 %v943_v11, %v792_v15 }
 0x21d   :  { %v1840_v16 = vpop.f32.mrf.mxu0 }
 0x233   :  { %v1136_v17 = vpop.f32.mrf.mxu1 }
 0x235   :  { %v1945_v18 = vpop.f32.mrf.mxu1 }
 0x23c   :  { %v1047_v20 = vpop.f32.mrf.mxu0 }
 0x23d   :  { %v1048_v25 = vadd.f32 %v1047_v20, %v944_v23 }
 0x23e   :  { %v1910_v21 = vpop.f32.mrf.mxu0 }
 0x23f   :  { %v1137_v27 = vadd.f32 %v1136_v17, %v1048_v25 }
 0x255   :  { %v1342_v22 = vpop.f32.mrf.mxu1 }
 0x257   :  { %v2015_v24 = vpop.f32.mrf.mxu1 }
 0x25d   :  { %v1255_v28 = vpop.f32.mrf.mxu0 }
 0x25e   :  { %v1256_v29 = vadd.f32 %v1255_v28, %v1137_v27 }
 0x25f   :  { %v1980_v30 = vpop.f32.mrf.mxu0 }
 0x260   :  { %v1343_v34 = vadd.f32 %v1342_v22, %v1256_v29 }
 0x262   :  { %v1346_v35 = vmul.f32 0.032258064, %v1343_v34 }
 0x264   :  { %2023 = vrsqrt.f32 %v1346_v35  ;;  %vm1349_vm1 = vcmp.eq.f32.partialorder %v1346_v35, inf  ;;  %v1352_v45 = vand.u32 2147483648, %v1346_v35  ;;  %vm1351_vm2 = vcmp.eq.f32.partialorder %v1346_v35, 0.0 }
 0x271   :  { %v2024_v40 = vpop.eup %2023 }
 0x272   :  { %v1348_v43 = vmul.f32 %v2024_v40, %v1346_v35 }
 0x274   :  { %v1350_v46 = vsel %vm1349_vm1, %v1346_v35, %v1348_v43 }
 0x275   :  { %v1353_v47 = vsel %vm1351_vm2, %v1352_v45, %v1350_v46 }
 0x276   :  { %v1354_v48 = vadd.f32 1e-06, %v1353_v47 }
 0x278   :  { %2025 = vrcp.f32 %v1354_v48 }
 0x285   :  { %v2026_v50 = vpop.eup %2025 }
 0x286   :  { %v1358_v55 = vmul.f32 %v2026_v50, %v2617_v0 }
 0x288   :  { %v1365_v59 = vmul.f32 %v1390_v53, %v1358_v55 }
 0x28a   :  { %v1372_v61 = vadd.f32 %v1391_v57, %v1365_v59 }
 0x28c   :  { %1373 = vst [vmem:[#allocation7] sm:$0xf] %v1372_v61 }
 0x28d   :  { %2078 = shalt.err (!%p2075_p0)
}
 0x28e   :  { %1383 = dma.vmem_to_hbm [thread:$0]  %s1381_s30, 64, %s2780_s4, [#allocation4]  }
 0x28f   :  { %2091 = dma.done.wait [#allocation4], 64  }
 0x290   :  { %2092 = vsyncadd [#allocation4], 4294967232 }
 0x291   :  { %1387 = vsyncpa [#allocation3], 1 }
 0x292   :  { %1388 = vsyncpa [#allocation6], 1 }
 0x293   :  { %1389 = vsyncpa [#allocation4], 1 }

</bundles_post_ra>
